<compile_context>
chip_gen: v7x
topology: tpu7x:2x2x1
jax: 0.10.0
libtpu: 0.0.40
codegen_flags: <defaults>
</compile_context>

<pallas_src>
import functools

import jax
import jax.numpy as jnp
from jax.experimental import pallas as pl
from jax.experimental.pallas import tpu as pltpu


def _conv3x3_bn_relu_kernel(x_ref, w_ref, b_ref, o_ref):
    # x_ref: (1, TH+2, W, 3*Cin)  bf16  halo'd, kw-unrolled input tile
    # w_ref: (3, 3*Cin, TCO)      bf16  per-kh weight planes, BN scale folded in
    # b_ref: (1, TCO)             f32   folded BN bias
    # o_ref: (1, TH, W, TCO)
    TH = o_ref.shape[1]
    W = o_ref.shape[2]
    TCO = o_ref.shape[3]
    KC = x_ref.shape[3]

    acc = jnp.zeros((TH * W, TCO), dtype=jnp.float32)
    # 3x3 conv == 3 matmuls of contiguous row slabs (kh taps) against a
    # (3*Cin, TCO) weight plane; the kw taps already live in the K dim.
    for kh in range(3):
        slab = x_ref[0, kh:kh + TH, :, :].reshape(TH * W, KC)
        acc += jnp.dot(slab, w_ref[kh], preferred_element_type=jnp.float32)

    y = jnp.maximum(acc + b_ref[0], 0.0)          # BN bias + ReLU in f32
    o_ref[0] = y.reshape(TH, W, TCO).astype(o_ref.dtype)


def _auto_h_tile(H, W, kc):
    """Largest divisor of H such that the halo'd bf16 input slab stays <= 4 MiB
    and the matmul M dim <= 1024 rows.  Bigger tiles amortize the ~0.35 us
    per-grid-step overhead and cut weight re-streaming, while double-buffered
    tiles stay far below the 32 MiB scoped-VMEM budget (v5e/v6e/v7x)."""
    for th in range(H, 0, -1):
        if H % th:
            continue
        rows = th * W                          # matmul M dim
        in_bytes = (th + 2) * W * kc * 2       # bf16 input tile
        if rows <= 1024 and in_bytes <= (4 << 20):
            return th
    return 1


@functools.partial(jax.jit, static_argnames=("eps", "h_tile"))
def conv3x3_bn_relu(x_nchw, weight, gamma, beta, running_mean, running_var,
                    eps=1e-5, h_tile=None):
    """x_nchw: (N, Cin, H, W); weight: (Cout, Cin, 3, 3) (PyTorch layouts)."""
    N, Cin, H, W = x_nchw.shape
    Cout = weight.shape[0]
    KC = 3 * Cin

    TH = _auto_h_tile(H, W, KC) if h_tile is None else int(h_tile)
    if H % TH != 0:
        raise ValueError("h_tile must divide H")
    nT = H // TH

    Cout_p = ((Cout + 127) // 128) * 128       # lane-dense / MXU-wide output
    TCO = 256 if Cout_p % 256 == 0 else 128
    nCo = Cout_p // TCO

    # ---- input: NCHW -> NHWC (channels on lanes), pad spatially by 1, then in
    # ONE fused expression fold the 3 kw taps into the channel axis (K = 3*Cin)
    # and cut H into TH-row tiles with a duplicated 2-row halo.  Pure layout
    # plumbing done once in HBM so every kernel block is a plain
    # non-overlapping BlockSpec window.
    x_nhwc = jnp.transpose(x_nchw, (0, 2, 3, 1)).astype(jnp.bfloat16)
    xp = jnp.pad(x_nhwc, ((0, 0), (1, 1), (1, 1), (0, 0)))
    x_tiles = jnp.concatenate(
        [
            jnp.stack([xp[:, t * TH:t * TH + TH + 2, kw:kw + W, :]
                       for t in range(nT)], axis=1)
            for kw in range(3)
        ],
        axis=-1,
    ).reshape(N * nT, TH + 2, W, KC)                                # (N*nT, TH+2, W, KC)

    # ---- weights: (Cout, Cin, 3, 3) -> (kh, kw*Cin, Cout); fold eval-mode BN
    # scale into the weights, zero-pad Cout to Cout_p, cast to bf16.
    scale = gamma / jnp.sqrt(running_var + eps)                     # (Cout,)
    bias = beta - running_mean * scale                              # (Cout,)
    w = jnp.transpose(weight, (2, 3, 1, 0)) * scale                 # (3, 3, Cin, Cout)
    w = w.reshape(3, KC, Cout)
    w = jnp.pad(w, ((0, 0), (0, 0), (0, Cout_p - Cout))).astype(jnp.bfloat16)
    bias_p = jnp.pad(bias, (0, Cout_p - Cout)).reshape(1, Cout_p).astype(jnp.float32)

    flops = 2 * N * H * W * Cout * 9 * Cin
    bytes_accessed = int(x_tiles.size * 2 + w.size * 2 + bias_p.size * 4
                         + N * H * W * Cout_p * 4)

    out_nhwc = pl.pallas_call(
        _conv3x3_bn_relu_kernel,
        out_shape=jax.ShapeDtypeStruct((N, H, W, Cout_p), x_nchw.dtype),
        grid_spec=pltpu.PrefetchScalarGridSpec(
            num_scalar_prefetch=0,
            grid=(N, nT, nCo),
            in_specs=[
                pl.BlockSpec((1, TH + 2, W, KC),
                             lambda n, t, co: (n * nT + t, 0, 0, 0)),
                pl.BlockSpec((3, KC, TCO), lambda n, t, co: (0, 0, co)),
                pl.BlockSpec((1, TCO), lambda n, t, co: (0, co)),
            ],
            out_specs=pl.BlockSpec((1, TH, W, TCO),
                                   lambda n, t, co: (n, t, 0, co)),
        ),
        compiler_params=pltpu.CompilerParams(
            dimension_semantics=("parallel", "parallel", "parallel"),
            vmem_limit_bytes=32 * 1024 * 1024),
        cost_estimate=pl.CostEstimate(flops=flops, transcendentals=0,
                                      bytes_accessed=bytes_accessed),
    )(x_tiles, w, bias_p)

    # TODO(synk): if the downstream consumer accepts NHWC, skip this transpose
    # (it is an extra HBM pass kept only to match the PyTorch NCHW convention).
    return jnp.transpose(out_nhwc[:, :, :, :Cout], (0, 3, 1, 2))


def _reference(x_nchw, weight, gamma, beta, running_mean, running_var,
               eps=1e-5):
    y = jax.lax.conv_general_dilated(
        x_nchw, weight, window_strides=(1, 1), padding=((1, 1), (1, 1)),
        dimension_numbers=("NCHW", "OIHW", "NCHW"))
    scale = gamma / jnp.sqrt(running_var + eps)
    bias = beta - running_mean * scale
    y = y * scale[None, :, None, None] + bias[None, :, None, None]
    return jnp.maximum(y, 0.0)


if __name__ == "__main__":
    key = jax.random.PRNGKey(0)
    k_x, k_w, k_g, k_b, k_m, k_v = jax.random.split(key, 6)

    N, Cin, H, W = 2, 4, 16, 16
    Cout = 8

    x = jax.random.normal(k_x, (N, Cin, H, W), dtype=jnp.float32)
    weight = jax.random.normal(k_w, (Cout, Cin, 3, 3), dtype=jnp.float32) * 0.1
    gamma = jax.random.normal(k_g, (Cout,), dtype=jnp.float32) * 0.1 + 1.0
    beta = jax.random.normal(k_b, (Cout,), dtype=jnp.float32) * 0.1
    running_mean = jax.random.normal(k_m, (Cout,), dtype=jnp.float32) * 0.1
    running_var = jax.random.uniform(k_v, (Cout,), dtype=jnp.float32,
                                     minval=0.5, maxval=1.5)

    # h_tile=8 exercises the halo'd spatial-tiling path (2 H-tiles per image).
    out = conv3x3_bn_relu(x, weight, gamma, beta, running_mean, running_var,
                          h_tile=8)
    out = jax.block_until_ready(out)

    ref = _reference(x, weight, gamma, beta, running_mean, running_var)
    assert out.shape == (N, Cout, H, W)
    # bf16 matmul inputs (f32 accumulation) -> slightly loosened tolerance
    # against the pure-f32 XLA reference.
    err = float(jnp.max(jnp.abs(out - ref)))
    assert jnp.allclose(out, ref, rtol=2e-2, atol=2e-2), err

    # Also exercise the auto-tiler path (nT=1, no halo duplication).
    out2 = conv3x3_bn_relu(x, weight, gamma, beta, running_mean, running_var)
    out2 = jax.block_until_ready(out2)
    assert jnp.allclose(out2, ref, rtol=2e-2, atol=2e-2)

    print("KERNEL_OK")
</pallas_src>

<mosaic_0001>
module attributes {stable_mosaic.version = 11 : i64} {
  func.func @_conv3x3_bn_relu_kernel(%arg0: i32, %arg1: i32, %arg2: i32, %arg3: memref<1x10x16x12xbf16, #tpu.memory_space<vmem>>, %arg4: memref<3x12x128xbf16, #tpu.memory_space<vmem>>, %arg5: memref<1x128xf32, #tpu.memory_space<vmem>>, %arg6: memref<1x8x16x128xf32, #tpu.memory_space<vmem>>) attributes {dimension_semantics = [#tpu.dimension_semantics<parallel>, #tpu.dimension_semantics<parallel>, #tpu.dimension_semantics<parallel>], iteration_bounds = array<i64: 2, 2, 1>, scalar_prefetch = 0 : i64, scratch_operands = 0 : i64, tpu.core_type = #tpu.core_type<tc>, window_params = [{transform_indices = @transform_0, window_bounds = array<i64: 1, 10, 16, 12>}, {transform_indices = @transform_1, window_bounds = array<i64: 3, 12, 128>}, {transform_indices = @transform_2, window_bounds = array<i64: 1, 128>}, {transform_indices = @transform_3, window_bounds = array<i64: 1, 8, 16, 128>}]} {
    %cst = arith.constant 0.000000e+00 : f32
    %0 = vector.broadcast %cst : f32 to vector<128x128xf32>
    %c0 = arith.constant 0 : index
    %c0_0 = arith.constant 0 : index
    %c0_1 = arith.constant 0 : index
    %c0_2 = arith.constant 0 : index
    %1 = vector.load %arg3[%c0, %c0_0, %c0_1, %c0_2] : memref<1x10x16x12xbf16, #tpu.memory_space<vmem>>, vector<1x8x16x12xbf16>
    %2 = vector.shape_cast %1 : vector<1x8x16x12xbf16> to vector<8x16x12xbf16>
    %3 = vector.shape_cast %2 : vector<8x16x12xbf16> to vector<128x12xbf16>
    %c0_3 = arith.constant 0 : index
    %c0_4 = arith.constant 0 : index
    %c0_5 = arith.constant 0 : index
    %4 = vector.load %arg4[%c0_3, %c0_4, %c0_5] : memref<3x12x128xbf16, #tpu.memory_space<vmem>>, vector<1x12x128xbf16>
    %5 = vector.shape_cast %4 : vector<1x12x128xbf16> to vector<12x128xbf16>
    %cst_6 = arith.constant dense<0.000000e+00> : vector<128x128xf32>
    %6 = tpu.matmul %3, %5, %cst_6 {dimension_numbers = #tpu.dot_dimension_numbers<[1], [0], [0], [1], [0, 0, 1, 1], [], []>} : vector<128x12xbf16>, vector<12x128xbf16>, vector<128x128xf32> -> vector<128x128xf32>
    %7 = arith.addf %0, %6 : vector<128x128xf32>
    %c0_7 = arith.constant 0 : index
    %c1 = arith.constant 1 : index
    %c0_8 = arith.constant 0 : index
    %c0_9 = arith.constant 0 : index
    %8 = vector.load %arg3[%c0_7, %c1, %c0_8, %c0_9] : memref<1x10x16x12xbf16, #tpu.memory_space<vmem>>, vector<1x8x16x12xbf16>
    %9 = vector.shape_cast %8 : vector<1x8x16x12xbf16> to vector<8x16x12xbf16>
    %10 = vector.shape_cast %9 : vector<8x16x12xbf16> to vector<128x12xbf16>
    %c1_10 = arith.constant 1 : index
    %c0_11 = arith.constant 0 : index
    %c0_12 = arith.constant 0 : index
    %11 = vector.load %arg4[%c1_10, %c0_11, %c0_12] : memref<3x12x128xbf16, #tpu.memory_space<vmem>>, vector<1x12x128xbf16>
    %12 = vector.shape_cast %11 : vector<1x12x128xbf16> to vector<12x128xbf16>
    %cst_13 = arith.constant dense<0.000000e+00> : vector<128x128xf32>
    %13 = tpu.matmul %10, %12, %cst_13 {dimension_numbers = #tpu.dot_dimension_numbers<[1], [0], [0], [1], [0, 0, 1, 1], [], []>} : vector<128x12xbf16>, vector<12x128xbf16>, vector<128x128xf32> -> vector<128x128xf32>
    %14 = arith.addf %7, %13 : vector<128x128xf32>
    %c0_14 = arith.constant 0 : index
    %c2 = arith.constant 2 : index
    %c0_15 = arith.constant 0 : index
    %c0_16 = arith.constant 0 : index
    %15 = vector.load %arg3[%c0_14, %c2, %c0_15, %c0_16] : memref<1x10x16x12xbf16, #tpu.memory_space<vmem>>, vector<1x8x16x12xbf16>
    %16 = vector.shape_cast %15 : vector<1x8x16x12xbf16> to vector<8x16x12xbf16>
    %17 = vector.shape_cast %16 : vector<8x16x12xbf16> to vector<128x12xbf16>
    %c2_17 = arith.constant 2 : index
    %c0_18 = arith.constant 0 : index
    %c0_19 = arith.constant 0 : index
    %18 = vector.load %arg4[%c2_17, %c0_18, %c0_19] : memref<3x12x128xbf16, #tpu.memory_space<vmem>>, vector<1x12x128xbf16>
    %19 = vector.shape_cast %18 : vector<1x12x128xbf16> to vector<12x128xbf16>
    %cst_20 = arith.constant dense<0.000000e+00> : vector<128x128xf32>
    %20 = tpu.matmul %17, %19, %cst_20 {dimension_numbers = #tpu.dot_dimension_numbers<[1], [0], [0], [1], [0, 0, 1, 1], [], []>} : vector<128x12xbf16>, vector<12x128xbf16>, vector<128x128xf32> -> vector<128x128xf32>
    %21 = arith.addf %14, %20 : vector<128x128xf32>
    %c0_21 = arith.constant 0 : index
    %c0_22 = arith.constant 0 : index
    %22 = vector.load %arg5[%c0_21, %c0_22] : memref<1x128xf32, #tpu.memory_space<vmem>>, vector<1x128xf32>
    %23 = vector.shape_cast %22 : vector<1x128xf32> to vector<128xf32>
    %24 = vector.shape_cast %23 : vector<128xf32> to vector<1x128xf32>
    %25 = vector.broadcast %24 : vector<1x128xf32> to vector<128x128xf32>
    %26 = arith.addf %21, %25 : vector<128x128xf32>
    %cst_23 = arith.constant 0.000000e+00 : f32
    %27 = vector.broadcast %cst_23 : f32 to vector<128x128xf32>
    %28 = arith.maximumf %26, %27 : vector<128x128xf32>
    %29 = vector.shape_cast %28 : vector<128x128xf32> to vector<8x16x128xf32>
    %c0_24 = arith.constant 0 : index
    %c0_25 = arith.constant 0 : index
    %c0_26 = arith.constant 0 : index
    %c0_27 = arith.constant 0 : index
    %30 = vector.load %arg6[%c0_24, %c0_25, %c0_26, %c0_27] : memref<1x8x16x128xf32, #tpu.memory_space<vmem>>, vector<1x8x16x128xf32>
    %31 = vector.shape_cast %30 : vector<1x8x16x128xf32> to vector<8x16x128xf32>
    %32 = vector.shape_cast %29 : vector<8x16x128xf32> to vector<1x8x16x128xf32>
    tpu.vector_store %arg6[%c0_24, %c0_25, %c0_26, %c0_27], %32 {strides = array<i32>} : memref<1x8x16x128xf32, #tpu.memory_space<vmem>>, vector<1x8x16x128xf32>,
    return
  }
  func.func @transform_0(%arg0: i32, %arg1: i32, %arg2: i32) -> (i32, i32, i32, i32) {
    %c2_i32 = arith.constant 2 : i32
    %0 = arith.muli %arg0, %c2_i32 : i32
    %1 = arith.addi %0, %arg1 : i32
    %c0_i32 = arith.constant 0 : i32
    %c0_i32_0 = arith.constant 0 : i32
    %c0_i32_1 = arith.constant 0 : i32
    %c0_i32_2 = arith.constant 0 : i32
    return %1, %c0_i32, %c0_i32_0, %c0_i32_1 : i32, i32, i32, i32
  }
  func.func @transform_1(%arg0: i32, %arg1: i32, %arg2: i32) -> (i32, i32, i32) {
    %c0_i32 = arith.constant 0 : i32
    %c0_i32_0 = arith.constant 0 : i32
    %c0_i32_1 = arith.constant 0 : i32
    return %c0_i32, %c0_i32_0, %arg2 : i32, i32, i32
  }
  func.func @transform_2(%arg0: i32, %arg1: i32, %arg2: i32) -> (i32, i32) {
    %c0_i32 = arith.constant 0 : i32
    %c0_i32_0 = arith.constant 0 : i32
    return %c0_i32, %arg2 : i32, i32
  }
  func.func @transform_3(%arg0: i32, %arg1: i32, %arg2: i32) -> (i32, i32, i32, i32) {
    %c0_i32 = arith.constant 0 : i32
    %c0_i32_0 = arith.constant 0 : i32
    return %arg0, %arg1, %c0_i32, %arg2 : i32, i32, i32, i32
  }
}

</mosaic_0001>

<bundles_post_ra>
// kernel: conv3x3_bn_relu.1
= control target key start
LH: loop header
LB: loop body
LE: loop exit
PB: predicated region body
PF: predicated region fallthrough
CT: control target
= control target key end

     0   :  { %s1377_s12 = smov 0   ;;  %s1379_s13 = smov 0   ;;  %s1542_s0 = inlined_call_operand.vmem [shape: bf16[4,10,16,12], index: 0, kind: input, shape index: {}]   ;;  %s1543_s1 = inlined_call_operand.vmem [shape: bf16[3,12,128], index: 1, kind: input, shape index: {}]   ;;  %s1544_s2 = inlined_call_operand.vmem [shape: f32[1,128], index: 2, kind: input, shape index: {}]   ;;  %s1545_s3 = inlined_call_operand.vmem [shape: f32[2,16,16,128], index: 3, kind: output, shape index: {}]  }
   0x1   :  { %s1381_s14 = smov 0   ;;  %s1383_s15 = smov 0  }
   0x2   :  { %s1385_s16 = smov 0  }
   0x3 LB: > { %s28_s17 = sadd.s32 1, %s1347_s14  ;;  %s32_s18 = sadd.s32 1, %s1351_s15  ;;  %s1355_s16 = sphi %s1385_s16, %s13_s16   ;;  %s1351_s15 = sphi %s1383_s15, %s1549_s15   ;;  %s1347_s14 = sphi %s1381_s14, %s1548_s14   ;;  %s1343_s13 = sphi %s1379_s13, %s1547_s13   ;;  %s1339_s12 = sphi %s1377_s12, %s1546_s12  }
   0x4   : > { %p30_p0 = scmp.ge.s32.totalorder %s28_s17, 2  ;;  %p1033_p1 = scmp.ge.s32.totalorder %s1355_s16, 1 }
   0x5   : > { %p185_p2 = scmp.lt.s32.totalorder %s1355_s16, 5 }
   0x6   : > { %s1551_s17 = smov (%p30_p0, %s28_s17), 0  ;;  %s1553_s18 = smov (!%p30_p0, %s32_s18), %s1351_s15 }
   0x7   : > { %p186_p3 = pnand %p1033_p1, %p185_p2  ;;  %p34_p4 = scmp.ge.s32.totalorder %s1553_s18, 2 }
   0x8   : > { %v1290_v0 = vld [vmem:[%s1543_s1 + $0x8] sm:$0x3f] (!%p186_p3)   ;;  %vm365_vm0 = vcmask (!%p186_p3), 1045504   ;;  %s1034_s21 = sshll.u32 (!%p186_p3), %s1343_s13, 1  ;;  %v1291_v1 = vld [vmem:[%s1543_s1] sm:$0x3f] (!%p186_p3)  }
   0x9   : > { %s1555_s18 = smov (%p34_p4, %s1553_s18), 0  ;;  %189 = sbr.rel (%p186_p3) target bundleno = 284 (0x11c), region = 32 }
   0xa   : > { %1245 = vmatprep.subr.msk.bf16.mxu1 (!%p186_p3), %vm365_vm0, %v1290_v0  ;;  %v367_v2 = vsel (!%p186_p3), %vm365_vm0, %v1290_v0, 0  ;;  %s227_s24 = sadd.s32 (!%p186_p3), %s1339_s12, %s1034_s21  ;;  %v1294_v3 = vld [vmem:[%s1543_s1 + $0x10] sm:$0x3f] (!%p186_p3)   ;;  %1246 = vmatprep.subr.msk.bf16.mxu0 (!%p186_p3), %vm365_vm0, %v1291_v1  ;;  %v536_v4 = vsel (!%p186_p3), %vm365_vm0, %v1291_v1, 0  ;;  %vm340_vm1 = vcmask (!%p186_p3), 97280   ;;  %s1036_s4 = sshll.u32 (!%p186_p3), %s1339_s12, 3 }
   0xb   : > { %1158 = vmatpush3.bf16.msra.mxu1 (!%p186_p3), %v367_v2  ;;  %p228_p5 = scmp.lt.s32.totalorder (!%p186_p3), %s227_s24, 3  ;;  %1176 = vmatpush3.bf16.msra.mxu0 (!%p186_p3), %v536_v4  ;;  %v725_v9 = vsel (!%p186_p3), %vm365_vm0, %v1294_v3, 0  ;;  %p243_p6 = scmp.lt.s32.totalorder (!%p186_p3), %s1343_s13, 1  ;;  %v1488_v39 = vld [vmem:[%s1544_s2] ss:$0 sm:$0xff] (!%p186_p3) }
   0xc   : > { %1247 = vmatprep.subr.msk.bf16.mxu1 (!%p186_p3), %vm365_vm0, %v1291_v1  ;;  %1248 = vmatprep.subr.msk.bf16.mxu0 (!%p186_p3), %vm365_vm0, %v1294_v3  ;;  %p245_p7 = scmp.lt.s32.totalorder (!%p186_p3), %s1036_s4, 15 }
  0x10   : > { %s1557_s24 = smov (!%p228_p5, %s227_s24), 3  ;;  %s1559_s13 = smov (!%p243_p6, %s1343_s13), 1 }
  0x11   : > { %s1249_s27 = smul.u32 80, %s1557_s24  ;;  %s1561_s4 = smov (!%p245_p7, %s1036_s4), 15 }
  0x12   : > { %s1037_s5 = sshll.u32 %s1561_s4, 1  ;;  %s1038_s6 = sshll.u32 %s1559_s13, 5 }
  0x13   : > { %s1431_s30 = scalar_lea.vmem %s1542_s0, %s1249_s27  ;;  %s252_s7 = sadd.s32 %s1038_s6, %s1037_s5 }
  0x14   : > { %v1292_v5 = vld [vmem:[%s1431_s30 + $0x8] sm:$0xff]   ;;  %v1293_v6 = vld [vmem:[%s1431_s30] sm:$0xff]   ;;  %v1295_v7 = vld [vmem:[%s1431_s30 + $0x10] sm:$0xff]   ;;  %s1039_s10 = sshll.u32 %s252_s7, 3 }
  0x15   : > { %1159 = vmatprep.mubr.msk.bf16.mxu1 %vm340_vm1, %v1292_v5  ;;  %1177 = vmatprep.mubr.msk.bf16.mxu0 %vm340_vm1, %v1293_v6  ;;  %v1296_v8 = vld [vmem:[%s1431_s30 + $0x8] sm:$0xff]   ;;  %v1297_v10 = vld [vmem:[%s1431_s30 + $0x18] sm:$0xff]   ;;  %v1298_v11 = vld [vmem:[%s1431_s30 + $0x10] sm:$0xff]   ;;  %s1494_s13 = scalar_lea.vmem %s1545_s3, %s1039_s10 }
  0x16   : > { %1160 = vmatmul.mubr.msk.bf16.vlgmr.msra.gmra.mrb[0].mxu1 %vm340_vm1, %v1295_v7  ;;  %1178 = vmatmul.mubr.msk.bf16.vlgmr.msra.gmra.mrb[0].mxu0 %vm340_vm1, %v1296_v8  ;;  %v1299_v12 = vld [vmem:[%s1431_s30 + $0x20] sm:$0xff]   ;;  %v1300_v13 = vld [vmem:[%s1431_s30 + $0x18] sm:$0xff]   ;;  %v1301_v14 = vld [vmem:[%s1431_s30 + $0x28] sm:$0xff]  }
  0x17   : > { %1212 = vmatpush3.bf16.msra.mxu1 %v536_v4  ;;  %1194 = vmatpush3.bf16.msra.mxu0 %v725_v9  ;;  %v1302_v15 = vld [vmem:[%s1431_s30 + $0x10] sm:$0xff]   ;;  %v1304_v17 = vld [vmem:[%s1431_s30 + $0x18] sm:$0xff]   ;;  %v1306_v19 = vld [vmem:[%s1431_s30 + $0x20] sm:$0xff]  }
  0x18   : > { %1163 = vmatprep.mubr.msk.bf16.mxu1 %vm340_vm1, %v1297_v10  ;;  %1181 = vmatprep.mubr.msk.bf16.mxu0 %vm340_vm1, %v1298_v11  ;;  %v1303_v16 = vld [vmem:[%s1431_s30 + $0x30] sm:$0xff]   ;;  %v1305_v18 = vld [vmem:[%s1431_s30 + $0x38] sm:$0xff]   ;;  %v1307_v20 = vld [vmem:[%s1431_s30 + $0x40] sm:$0xff]  }
  0x19   : > { %v1308_v21 = vld [vmem:[%s1431_s30 + $0x28] sm:$0xff]   ;;  %v1309_v22 = vld [vmem:[%s1431_s30 + $0x20] sm:$0xff]   ;;  %v1310_v23 = vld [vmem:[%s1431_s30 + $0x30] sm:$0xff]  }
  0x1a   : > { %v1311_v24 = vld [vmem:[%s1431_s30 + $0x28] sm:$0xff]   ;;  %v1312_v25 = vld [vmem:[%s1431_s30 + $0x38] sm:$0xff]   ;;  %v1313_v26 = vld [vmem:[%s1431_s30 + $0x30] sm:$0xff]  }
  0x1b   : > { %v1314_v27 = vld [vmem:[%s1431_s30 + $0x40] sm:$0xff]   ;;  %v1315_v28 = vld [vmem:[%s1431_s30 + $0x38] sm:$0xff]   ;;  %v1316_v29 = vld [vmem:[%s1431_s30 + $0x48] sm:$0xff]  }
  0x1e   : > { %1164 = vmatmul.mubr.msk.bf16.gmra.mrb[4].mxu1 %vm340_vm1, %v1299_v12  ;;  %1182 = vmatmul.mubr.msk.bf16.gmra.mrb[4].mxu0 %vm340_vm1, %v1300_v13 }
  0x1f   : > { %1167 = vmatprep.mubr.msk.bf16.mxu1 %vm340_vm1, %v1301_v14  ;;  %1195 = vmatprep.mubr.msk.bf16.mxu0 %vm340_vm1, %v1302_v15 }
  0x26   : > { %1168 = vmatmul.mubr.msk.bf16.gmra.mrb[8].mxu1 %vm340_vm1, %v1303_v16  ;;  %1196 = vmatmul.mubr.msk.bf16.vlgmr.msra.gmra.mrb[0].mxu0 %vm340_vm1, %v1304_v17 }
  0x27   : > { %1171 = vmatprep.mubr.msk.bf16.mxu1 %vm340_vm1, %v1305_v18  ;;  %1199 = vmatprep.mubr.msk.bf16.mxu0 %vm340_vm1, %v1306_v19 }
  0x2e   : > { %1172 = vmatmul.mubr.msk.bf16.gmra.mrb[12].mxu1 %vm340_vm1, %v1307_v20  ;;  %1200 = vmatmul.mubr.msk.bf16.gmra.mrb[4].mxu0 %vm340_vm1, %v1308_v21 }
  0x2f   : > { %1185 = vmatprep.mubr.msk.bf16.mxu1 %vm340_vm1, %v1309_v22  ;;  %1203 = vmatprep.mubr.msk.bf16.mxu0 %vm340_vm1, %v1310_v23 }
  0x36   : > { %1186 = vmatmul.mubr.msk.bf16.vlgmr.msra.gmra.mrb[8].mxu1 %vm340_vm1, %v1311_v24  ;;  %1204 = vmatmul.mubr.msk.bf16.gmra.mrb[8].mxu0 %vm340_vm1, %v1312_v25 }
  0x37   : > { %1189 = vmatprep.mubr.msk.bf16.mxu1 %vm340_vm1, %v1313_v26  ;;  %1207 = vmatprep.mubr.msk.bf16.mxu0 %vm340_vm1, %v1314_v27 }
  0x3e   : > { %1190 = vmatmul.mubr.msk.bf16.gmra.mrb[12].mxu1 %vm340_vm1, %v1315_v28  ;;  %1208 = vmatmul.mubr.msk.bf16.gmra.mrb[12].mxu0 %vm340_vm1, %v1316_v29 }
  0xe9   : > { %v1161_v30 = vpop.f32.mrb[0].mxu1 }
  0xea   : > { %v403_v31 = vpop.f32.mrb[1].mxu1 }
  0xeb   : > { %v1162_v32 = vpop.f32.mrb[2].mxu1 }
  0xec   : > { %v406_v33 = vpop.f32.mrb[3].mxu1 }
  0xf1   : > { %v1165_v34 = vpop.f32.mrb[4].mxu1 }
  0xf2   : > { %v419_v35 = vpop.f32.mrb[5].mxu1 }
  0xf3   : > { %v1166_v36 = vpop.f32.mrb[6].mxu1 }
  0xf4   : > { %v422_v37 = vpop.f32.mrb[7].mxu1 }
  0xf9   : > { %v1197_v38 = vpop.f32.mrb[0].mxu0 }
  0xfa   : > { %v1213_v40 = vadd.f32 %v1197_v38, %v1161_v30  ;;  %v761_v41 = vpop.f32.mrb[1].mxu0 }
  0xfb   : > { %v1214_v42 = vadd.f32 %v761_v41, %v403_v31  ;;  %v1198_v43 = vpop.f32.mrb[2].mxu0 }
  0xfc   : > { %v849_v44 = vadd.f32 %v1213_v40, %v1488_v39  ;;  %v1215_v45 = vadd.f32 %v1198_v43, %v1162_v32  ;;  %v764_v46 = vpop.f32.mrb[3].mxu0 }
  0xfd   : > { %v847_v47 = vadd.f32 %v1214_v42, %v1488_v39  ;;  %v1216_v48 = vadd.f32 %v764_v46, %v406_v33 }
  0xfe   : > { %v865_v49 = vmax.f32 %v849_v44, 0.0  ;;  %v850_v50 = vadd.f32 %v1215_v45, %v1488_v39 }
  0xff   : > { %v863_v51 = vmax.f32 %v847_v47, 0.0  ;;  %v848_v52 = vadd.f32 %v1216_v48, %v1488_v39 }
 0x100   : > { %881 = vst [vmem:[%s1494_s13 + $0x10] sm:$0xff] %v865_v49  ;;  %v866_v53 = vmax.f32 %v850_v50, 0.0 }
 0x101   : > { %879 = vst [vmem:[%s1494_s13] sm:$0xff] %v863_v51  ;;  %v864_v54 = vmax.f32 %v848_v52, 0.0  ;;  %v1201_v55 = vpop.f32.mrb[4].mxu0 }
 0x102   : > { %882 = vst [vmem:[%s1494_s13 + $0x18] sm:$0xff] %v866_v53  ;;  %v1217_v56 = vadd.f32 %v1201_v55, %v1165_v34  ;;  %v777_v57 = vpop.f32.mrb[5].mxu0 }
 0x103   : > { %880 = vst [vmem:[%s1494_s13 + $0x8] sm:$0xff] %v864_v54  ;;  %v1218_v58 = vadd.f32 %v777_v57, %v419_v35  ;;  %v1202_v59 = vpop.f32.mrb[6].mxu0 }
 0x104   : > { %v853_v60 = vadd.f32 %v1217_v56, %v1488_v39  ;;  %v1219_v61 = vadd.f32 %v1202_v59, %v1166_v36  ;;  %v780_v62 = vpop.f32.mrb[7].mxu0 }
 0x105   : > { %v851_v63 = vadd.f32 %v1218_v58, %v1488_v39  ;;  %v1220_v0 = vadd.f32 %v780_v62, %v422_v37 }
 0x106   : > { %v869_v1 = vmax.f32 %v853_v60, 0.0  ;;  %v854_v2 = vadd.f32 %v1219_v61, %v1488_v39 }
 0x107   : > { %v867_v3 = vmax.f32 %v851_v63, 0.0  ;;  %v852_v4 = vadd.f32 %v1220_v0, %v1488_v39 }
 0x108   : > { %885 = vst [vmem:[%s1494_s13 + $0x30] sm:$0xff] %v869_v1  ;;  %v870_v5 = vmax.f32 %v854_v2, 0.0 }
 0x109   : > { %v1187_v6 = vpop.f32.mrb[8].mxu1  ;;  %883 = vst [vmem:[%s1494_s13 + $0x20] sm:$0xff] %v867_v3  ;;  %v868_v7 = vmax.f32 %v852_v4, 0.0  ;;  %v1205_v8 = vpop.f32.mrb[8].mxu0 }
 0x10a   : > { %v604_v9 = vpop.f32.mrb[9].mxu1  ;;  %886 = vst [vmem:[%s1494_s13 + $0x38] sm:$0xff] %v870_v5  ;;  %v1221_v10 = vadd.f32 %v1205_v8, %v1187_v6  ;;  %v793_v11 = vpop.f32.mrb[9].mxu0 }
 0x10b   : > { %v1188_v12 = vpop.f32.mrb[10].mxu1  ;;  %884 = vst [vmem:[%s1494_s13 + $0x28] sm:$0xff] %v868_v7  ;;  %v1222_v13 = vadd.f32 %v793_v11, %v604_v9  ;;  %v1206_v14 = vpop.f32.mrb[10].mxu0 }
 0x10c   : > { %v607_v15 = vpop.f32.mrb[11].mxu1  ;;  %v857_v16 = vadd.f32 %v1221_v10, %v1488_v39  ;;  %v1223_v17 = vadd.f32 %v1206_v14, %v1188_v12  ;;  %v796_v18 = vpop.f32.mrb[11].mxu0 }
 0x10d   : > { %v855_v19 = vadd.f32 %v1222_v13, %v1488_v39  ;;  %v1224_v20 = vadd.f32 %v796_v18, %v607_v15 }
 0x10e   : > { %v873_v21 = vmax.f32 %v857_v16, 0.0  ;;  %v858_v22 = vadd.f32 %v1223_v17, %v1488_v39 }
 0x10f   : > { %v871_v23 = vmax.f32 %v855_v19, 0.0  ;;  %v856_v24 = vadd.f32 %v1224_v20, %v1488_v39 }
 0x110   : > { %889 = vst [vmem:[%s1494_s13 + $0x50] sm:$0xff] %v873_v21  ;;  %v874_v25 = vmax.f32 %v858_v22, 0.0 }
 0x111   : > { %v1191_v26 = vpop.f32.mrb[12].mxu1  ;;  %887 = vst [vmem:[%s1494_s13 + $0x40] sm:$0xff] %v871_v23  ;;  %v872_v27 = vmax.f32 %v856_v24, 0.0  ;;  %v1209_v28 = vpop.f32.mrb[12].mxu0 }
 0x112   : > { %v620_v29 = vpop.f32.mrb[13].mxu1  ;;  %890 = vst [vmem:[%s1494_s13 + $0x58] sm:$0xff] %v874_v25  ;;  %v1225_v30 = vadd.f32 %v1209_v28, %v1191_v26  ;;  %v809_v31 = vpop.f32.mrb[13].mxu0 }
 0x113   : > { %v1192_v32 = vpop.f32.mrb[14].mxu1  ;;  %888 = vst [vmem:[%s1494_s13 + $0x48] sm:$0xff] %v872_v27  ;;  %v1226_v33 = vadd.f32 %v809_v31, %v620_v29  ;;  %v1210_v34 = vpop.f32.mrb[14].mxu0 }
 0x114   : > { %v623_v35 = vpop.f32.mrb[15].mxu1  ;;  %v861_v36 = vadd.f32 %v1225_v30, %v1488_v39  ;;  %v1227_v37 = vadd.f32 %v1210_v34, %v1192_v32  ;;  %v812_v38 = vpop.f32.mrb[15].mxu0 }
 0x115   : > { %v859_v40 = vadd.f32 %v1226_v33, %v1488_v39  ;;  %v1228_v41 = vadd.f32 %v812_v38, %v623_v35 }
 0x116   : > { %v877_v42 = vmax.f32 %v861_v36, 0.0  ;;  %v862_v43 = vadd.f32 %v1227_v37, %v1488_v39 }
 0x117   : > { %v875_v44 = vmax.f32 %v859_v40, 0.0  ;;  %v860_v45 = vadd.f32 %v1228_v41, %v1488_v39 }
 0x118   : > { %893 = vst [vmem:[%s1494_s13 + $0x70] sm:$0xff] %v877_v42  ;;  %v878_v46 = vmax.f32 %v862_v43, 0.0 }
 0x119   : > { %891 = vst [vmem:[%s1494_s13 + $0x60] sm:$0xff] %v875_v44  ;;  %v876_v47 = vmax.f32 %v860_v45, 0.0 }
 0x11a   : > { %894 = vst [vmem:[%s1494_s13 + $0x78] sm:$0xff] %v878_v46 }
 0x11b   : > { %892 = vst [vmem:[%s1494_s13 + $0x68] sm:$0xff] %v876_v47 }
 0x11c PF: > { %s13_s16 = sadd.s32 1, %s1355_s16   ;;  %s1546_s12 = smov %s1347_s14 }
 0x11d   : > { %p10_p8 = scmp.ge.s32.totalorder %s13_s16, 6   ;;  %s1547_s13 = smov %s1351_s15 }
 0x11e   : > { %s1548_s14 = smov %s1551_s17  ;;  %s1549_s15 = smov %s1555_s18 }
 0x11f   :  { %12 = sbr.rel (!%p10_p8) target bundleno = 3 (0x3), region = 72 }

</bundles_post_ra>
